<compile_context>
chip_gen: v5e
topology: v5e:2x2
jax: 0.10.0
libtpu: 0.0.40
codegen_flags: <defaults>
</compile_context>

<pallas_src>
import math
from functools import partial

import jax
import jax.numpy as jnp
from jax import lax
from jax.experimental import pallas as pl
from jax.experimental.pallas import tpu as pltpu


_SQRT_2_OVER_PI = 0.7978845608028654
_MASK_FILL = -100000.0


def _gelu_tanh(x):
    # TODO(synk): torch F.gelu defaults to the exact erf GELU; the tanh approximation is
    # used (drift < ~1e-3) because erf lowering is not guaranteed in Mosaic.
    return 0.5 * x * (1.0 + jnp.tanh(_SQRT_2_OVER_PI * (x + 0.044715 * x * x * x)))


def _layernorm(x, w, b):
    # Matches torch: (x - mean) / x.std() with UNBIASED std (ddof=1), no epsilon.
    d = x.shape[-1]
    mu = jnp.mean(x, axis=-1, keepdims=True)
    xc = x - mu
    var = jnp.sum(xc * xc, axis=-1, keepdims=True) / (d - 1)
    return w * (xc * lax.rsqrt(var)) + b


def _transformer_block_kernel(
    x_ref,                      # (seq, d_model)        current batch slab (batch squeezed)
    ln1_w_ref, ln1_b_ref,       # (1, d_model)
    qkv_w_ref, qkv_b_ref,       # (d_model, 3*H*d_head), (1, 3*H*d_head)   fused QKV
    o_w_ref, o_b_ref,           # (H*d_head, d_model),  (1, d_model)       fused out-proj
    ln2_w_ref, ln2_b_ref,       # (1, d_model)
    in_w_ref, in_b_ref,         # (d_model, d_mlp), (1, d_mlp)
    out_w_ref, out_b_ref,       # (d_mlp, d_model), (1, d_model)
    o_ref,                      # (seq, d_model)        output slab
    *, n_heads, d_head, matmul_dtype,
):
    x = x_ref[...].astype(jnp.float32)
    seq, d_model = x.shape
    hd = n_heads * d_head

    # ---- ln1 ----
    xn = _layernorm(x, ln1_w_ref[...], ln1_b_ref[...])

    # ---- fused QKV projection: one (seq, d_model) @ (d_model, 3*H*d_head) matmul ----
    qkv = (jnp.dot(xn.astype(matmul_dtype), qkv_w_ref[...],
                   preferred_element_type=jnp.float32)
           + qkv_b_ref[...])                                   # single fused bias row

    def split_heads(m):
        # (seq, H*d_head) -> (H, seq, d_head), head-leading (batch dim) layout, built
        # from static lane slices + concat (no general transpose needed).
        return jnp.stack([m[:, h * d_head:(h + 1) * d_head] for h in range(n_heads)],
                         axis=0)

    qh = split_heads(qkv[:, 0 * hd:1 * hd])
    kh = split_heads(qkv[:, 1 * hd:2 * hd])
    vh = split_heads(qkv[:, 2 * hd:3 * hd])

    # ---- causal multi-head attention: heads batched in 3-D dot_generals ----
    # TODO(synk): flash-tile over (q_tile, k_tile) for long sequences so the full
    # (H, seq, seq) logits slab is never live (mandatory on v7x's 64 MiB VMEM).
    scale = 1.0 / math.sqrt(d_head)
    logits = jnp.einsum("hqe,hke->hqk",
                        qh.astype(matmul_dtype), kh.astype(matmul_dtype),
                        preferred_element_type=jnp.float32) * scale      # f32 logits
    row = lax.broadcasted_iota(jnp.int32, (seq, seq), 0)                 # q position
    col = lax.broadcasted_iota(jnp.int32, (seq, seq), 1)                 # k position
    logits = jnp.where((col > row)[None, :, :], _MASK_FILL, logits)
    m = jnp.max(logits, axis=-1, keepdims=True)
    p = jnp.exp(logits - m)
    # EUP approximate reciprocal instead of a VALU divide in the softmax epilogue.
    scores = p * pl.reciprocal(jnp.sum(p, axis=-1, keepdims=True), approx=True)

    attn = jnp.einsum("hqk,hke->hqe",
                      scores.astype(matmul_dtype), vh.astype(matmul_dtype),
                      preferred_element_type=jnp.float32)                # (H, seq, d_head)

    # ---- fused output projection: one (seq, H*d_head) @ (H*d_head, d_model) matmul ----
    attn_flat = jnp.concatenate([attn[h] for h in range(n_heads)], axis=1)
    attn_out = (jnp.dot(attn_flat.astype(matmul_dtype), o_w_ref[...],
                        preferred_element_type=jnp.float32)
                + o_b_ref[...])
    resid_attn = x + attn_out

    # ---- ln2 + MLP ----
    # TODO(synk): for large d_mlp, chunk d_mlp over an "arbitrary" grid axis with an f32
    # VMEM accumulator instead of keeping In_w/Out_w fully resident (v7x VMEM budget).
    xn2 = _layernorm(resid_attn, ln2_w_ref[...], ln2_b_ref[...])
    hmid = (jnp.dot(xn2.astype(matmul_dtype), in_w_ref[...],
                    preferred_element_type=jnp.float32) + in_b_ref[...])
    hmid = _gelu_tanh(hmid)
    mlp_out = (jnp.dot(hmid.astype(matmul_dtype), out_w_ref[...],
                       preferred_element_type=jnp.float32) + out_b_ref[...])

    # ---- final residuals (matches PyTorch block exactly: 2*x + attn + mlp) ----
    o_ref[...] = (x + resid_attn + mlp_out).astype(o_ref.dtype)


def transformer_block(x, params, *, matmul_dtype=jnp.float32):
    """x: [batch, seq, d_model]; params: dict of TransformerBlock parameters.

    matmul_dtype: dtype of MXU operands. float32 reproduces PyTorch numerics;
    bfloat16 is recommended on v6e/v7x (accumulation stays f32, LN/softmax stay f32).
    """
    b, s, d_model = x.shape
    n_heads, _, d_head = params["Q_w"].shape
    d_mlp = params["In_w"].shape[1]
    hd = n_heads * d_head
    f32 = jnp.float32

    def head_major(w):  # (H, d_model, d_head) -> (d_model, H*d_head)
        return jnp.transpose(w, (1, 0, 2)).reshape(d_model, hd)

    # Fused QKV weight/bias (one MXU matmul + one bias add in-kernel).
    qkv_w = jnp.concatenate(
        [head_major(params["Q_w"]), head_major(params["K_w"]), head_major(params["V_w"])],
        axis=1).astype(matmul_dtype)
    qkv_b = jnp.concatenate(
        [params["Q_b"].reshape(hd), params["K_b"].reshape(hd), params["V_b"].reshape(hd)]
    ).reshape(1, 3 * hd).astype(f32)

    # Fused output projection weight.
    o_w = params["O_w"].reshape(hd, d_model).astype(matmul_dtype)
    o_b = params["O_b"].reshape(1, d_model).astype(f32)

    ln1_w = params["ln1_w"].reshape(1, d_model).astype(f32)
    ln1_b = params["ln1_b"].reshape(1, d_model).astype(f32)
    ln2_w = params["ln2_w"].reshape(1, d_model).astype(f32)
    ln2_b = params["ln2_b"].reshape(1, d_model).astype(f32)
    in_w = params["In_w"].astype(matmul_dtype)
    in_b = params["In_b"].reshape(1, d_mlp).astype(f32)
    out_w = params["Out_w"].astype(matmul_dtype)
    out_b = params["Out_b"].reshape(1, d_model).astype(f32)

    operands = (x, ln1_w, ln1_b, qkv_w, qkv_b, o_w, o_b,
                ln2_w, ln2_b, in_w, in_b, out_w, out_b)

    def full_spec(a):
        nd = a.ndim

        def imap(bb):
            return (0,) * nd

        # Constant index_map -> weight DMA'd once, kept resident in VMEM across grid steps.
        # TODO(synk): single-buffer these weights (pipeline_mode=pl.Buffered(1)) once that
        # path is validated; default double-buffering doubles resident-weight VMEM on v7x.
        return pl.BlockSpec(a.shape, imap)

    in_specs = [
        # x: one lane-dense (seq, d_model) slab per grid step; leading batch dim squeezed.
        pl.BlockSpec((None, s, d_model), lambda bb: (bb, 0, 0)),
    ] + [full_spec(a) for a in operands[1:]]
    out_specs = pl.BlockSpec((None, s, d_model), lambda bb: (bb, 0, 0))

    # Advisory cost estimate for the XLA scheduler around this custom call.
    flops = b * (2 * s * d_model * 3 * hd             # fused QKV projection
                 + 2 * 2 * n_heads * s * s * d_head   # QK^T and PV
                 + 2 * s * hd * d_model               # fused output projection
                 + 2 * 2 * s * d_model * d_mlp)       # MLP
    transcendentals = b * (n_heads * s * s + s * d_mlp)
    weight_bytes = sum(int(a.size) * a.dtype.itemsize for a in operands[1:])
    io_bytes = 2 * b * s * d_model * x.dtype.itemsize
    cost = pl.CostEstimate(flops=int(flops), transcendentals=int(transcendentals),
                           bytes_accessed=int(io_bytes + weight_bytes))

    # VMEM budget from measured operand sizes (double-buffered) + activation headroom,
    # capped at 48 MiB to stay under v7x's 64 MiB physical VMEM (128 MiB on v5e/v6e).
    block_bytes = 2 * s * d_model * x.dtype.itemsize
    vmem_limit = min(max(4 * (weight_bytes + block_bytes) + (4 << 20), 16 << 20), 48 << 20)

    kernel = partial(_transformer_block_kernel, n_heads=n_heads, d_head=d_head,
                     matmul_dtype=matmul_dtype)

    return pl.pallas_call(
        kernel,
        out_shape=jax.ShapeDtypeStruct((b, s, d_model), x.dtype),
        grid_spec=pltpu.PrefetchScalarGridSpec(
            num_scalar_prefetch=0,
            grid=(b,),
            in_specs=in_specs,
            out_specs=out_specs,
        ),
        compiler_params=pltpu.CompilerParams(
            dimension_semantics=("parallel",),
            vmem_limit_bytes=int(vmem_limit),
        ),
        cost_estimate=cost,
    )(*operands)


# ------------------------------ reference + init (pure JAX) ------------------------------

def transformer_block_ref(x, params):
    d_head = params["Q_w"].shape[-1]
    s = x.shape[1]

    def layernorm(v, w, b):
        mu = v.mean(-1, keepdims=True)
        vc = v - mu
        var = (vc * vc).sum(-1, keepdims=True) / (v.shape[-1] - 1)
        return w * (vc / jnp.sqrt(var)) + b

    hi = "highest"
    xn = layernorm(x, params["ln1_w"], params["ln1_b"])
    q = jnp.einsum("bpd,hde->bphe", xn, params["Q_w"], precision=hi) + params["Q_b"]
    k = jnp.einsum("bpd,hde->bphe", xn, params["K_w"], precision=hi) + params["K_b"]
    v = jnp.einsum("bpd,hde->bphe", xn, params["V_w"], precision=hi) + params["V_b"]
    logits = jnp.einsum("bqhe,bkhe->bhqk", q, k, precision=hi) / math.sqrt(d_head)
    mask = jnp.triu(jnp.ones((s, s), dtype=bool), k=1)
    logits = jnp.where(mask, _MASK_FILL, logits)
    scores = jax.nn.softmax(logits, axis=-1)
    attn = jnp.einsum("bhqk,bkhe->bqhe", scores, v, precision=hi)
    attn_o = jnp.einsum("bqhe,hed->bqd", attn, params["O_w"], precision=hi) + params["O_b"]
    resid_attn = x + attn_o
    xn2 = layernorm(resid_attn, params["ln2_w"], params["ln2_b"])
    hmid = _gelu_tanh(jnp.einsum("bpd,dm->bpm", xn2, params["In_w"], precision=hi)
                      + params["In_b"])
    mlp_o = jnp.einsum("bpm,md->bpd", hmid, params["Out_w"], precision=hi) + params["Out_b"]
    return x + resid_attn + mlp_o


def init_params(key, n_heads, d_head, d_model, d_mlp, dtype=jnp.float32):
    keys = jax.random.split(key, 12)

    def xavier(k, shape, fan_in, fan_out):
        std = math.sqrt(2.0 / (fan_in + fan_out))
        return (jax.random.normal(k, shape, dtype) * std).astype(dtype)

    return {
        "ln1_w": jnp.ones((d_model,), dtype),
        "ln1_b": jnp.zeros((d_model,), dtype),
        "ln2_w": jnp.ones((d_model,), dtype),
        "ln2_b": jnp.zeros((d_model,), dtype),
        "Q_w": xavier(keys[0], (n_heads, d_model, d_head), d_model, d_head),
        "K_w": xavier(keys[1], (n_heads, d_model, d_head), d_model, d_head),
        "V_w": xavier(keys[2], (n_heads, d_model, d_head), d_model, d_head),
        "O_w": xavier(keys[3], (n_heads, d_head, d_model), d_head, d_model),
        "Q_b": 0.02 * jax.random.normal(keys[4], (n_heads, d_head), dtype),
        "K_b": 0.02 * jax.random.normal(keys[5], (n_heads, d_head), dtype),
        "V_b": 0.02 * jax.random.normal(keys[6], (n_heads, d_head), dtype),
        "O_b": 0.02 * jax.random.normal(keys[7], (d_model,), dtype),
        "In_w": xavier(keys[8], (d_model, d_mlp), d_model, d_mlp),
        "In_b": 0.02 * jax.random.normal(keys[9], (d_mlp,), dtype),
        "Out_w": xavier(keys[10], (d_mlp, d_model), d_mlp, d_model),
        "Out_b": 0.02 * jax.random.normal(keys[11], (d_model,), dtype),
    }


if __name__ == "__main__":
    key = jax.random.PRNGKey(0)
    k_param, k_x = jax.random.split(key)

    batch, seq = 2, 8
    n_heads, d_head, d_model, d_mlp = 4, 8, 32, 64

    params = init_params(k_param, n_heads, d_head, d_model, d_mlp)
    x = jax.random.normal(k_x, (batch, seq, d_model), dtype=jnp.float32)

    ref = transformer_block_ref(x, params)

    # f32 MXU operands: PyTorch-matching numerics (drift dominated by the EUP
    # approximate-reciprocal softmax normalization, a requested optimization).
    out = jax.block_until_ready(transformer_block(x, params))
    assert out.shape == (batch, seq, d_model), out.shape
    err_f32 = float(jnp.max(jnp.abs(out - ref)))
    assert err_f32 < 5e-2, f"f32 path mismatch vs reference, max abs err = {err_f32}"

    # bf16 MXU operands (recommended on v6e/v7x): looser tolerance.
    out_bf16 = jax.block_until_ready(
        transformer_block(x, params, matmul_dtype=jnp.bfloat16))
    err_bf16 = float(jnp.max(jnp.abs(out_bf16 - ref)))
    assert err_bf16 < 2e-1, f"bf16 path mismatch vs reference, max abs err = {err_bf16}"

    print("KERNEL_OK")
</pallas_src>

<mosaic_0001>
module attributes {stable_mosaic.version = 11 : i64} {
  func.func @_transformer_block_kernel(%arg0: i32, %arg1: memref<1x8x32xf32, #tpu.memory_space<vmem>>, %arg2: memref<1x32xf32, #tpu.memory_space<vmem>>, %arg3: memref<1x32xf32, #tpu.memory_space<vmem>>, %arg4: memref<32x96xf32, #tpu.memory_space<vmem>>, %arg5: memref<1x96xf32, #tpu.memory_space<vmem>>, %arg6: memref<32x32xf32, #tpu.memory_space<vmem>>, %arg7: memref<1x32xf32, #tpu.memory_space<vmem>>, %arg8: memref<1x32xf32, #tpu.memory_space<vmem>>, %arg9: memref<1x32xf32, #tpu.memory_space<vmem>>, %arg10: memref<32x64xf32, #tpu.memory_space<vmem>>, %arg11: memref<1x64xf32, #tpu.memory_space<vmem>>, %arg12: memref<64x32xf32, #tpu.memory_space<vmem>>, %arg13: memref<1x32xf32, #tpu.memory_space<vmem>>, %arg14: memref<1x8x32xf32, #tpu.memory_space<vmem>>) attributes {dimension_semantics = [#tpu.dimension_semantics<parallel>], iteration_bounds = array<i64: 2>, scalar_prefetch = 0 : i64, scratch_operands = 0 : i64, tpu.core_type = #tpu.core_type<tc>, window_params = [{transform_indices = @transform_0, window_bounds = array<i64: 1, 8, 32>}, {pipeline_mode = #tpu.pipeline_mode<synchronous>, transform_indices = @transform_1, window_bounds = array<i64: 1, 32>}, {pipeline_mode = #tpu.pipeline_mode<synchronous>, transform_indices = @transform_2, window_bounds = array<i64: 1, 32>}, {pipeline_mode = #tpu.pipeline_mode<synchronous>, transform_indices = @transform_3, window_bounds = array<i64: 32, 96>}, {pipeline_mode = #tpu.pipeline_mode<synchronous>, transform_indices = @transform_4, window_bounds = array<i64: 1, 96>}, {pipeline_mode = #tpu.pipeline_mode<synchronous>, transform_indices = @transform_5, window_bounds = array<i64: 32, 32>}, {pipeline_mode = #tpu.pipeline_mode<synchronous>, transform_indices = @transform_6, window_bounds = array<i64: 1, 32>}, {pipeline_mode = #tpu.pipeline_mode<synchronous>, transform_indices = @transform_7, window_bounds = array<i64: 1, 32>}, {pipeline_mode = #tpu.pipeline_mode<synchronous>, transform_indices = @transform_8, window_bounds = array<i64: 1, 32>}, {pipeline_mode = #tpu.pipeline_mode<synchronous>, transform_indices = @transform_9, window_bounds = array<i64: 32, 64>}, {pipeline_mode = #tpu.pipeline_mode<synchronous>, transform_indices = @transform_10, window_bounds = array<i64: 1, 64>}, {pipeline_mode = #tpu.pipeline_mode<synchronous>, transform_indices = @transform_11, window_bounds = array<i64: 64, 32>}, {pipeline_mode = #tpu.pipeline_mode<synchronous>, transform_indices = @transform_12, window_bounds = array<i64: 1, 32>}, {transform_indices = @transform_13, window_bounds = array<i64: 1, 8, 32>}]} {
    %c0 = arith.constant 0 : index
    %c0_0 = arith.constant 0 : index
    %c0_1 = arith.constant 0 : index
    %0 = vector.load %arg1[%c0, %c0_0, %c0_1] : memref<1x8x32xf32, #tpu.memory_space<vmem>>, vector<1x8x32xf32>
    %1 = vector.shape_cast %0 : vector<1x8x32xf32> to vector<8x32xf32>
    %c0_2 = arith.constant 0 : index
    %c0_3 = arith.constant 0 : index
    %2 = vector.load %arg2[%c0_2, %c0_3] : memref<1x32xf32, #tpu.memory_space<vmem>>, vector<1x32xf32>
    %c0_4 = arith.constant 0 : index
    %c0_5 = arith.constant 0 : index
    %3 = vector.load %arg3[%c0_4, %c0_5] : memref<1x32xf32, #tpu.memory_space<vmem>>, vector<1x32xf32>
    %cst = arith.constant dense<0.000000e+00> : vector<8xf32>
    %4 = vector.multi_reduction <add>, %1, %cst [1] : vector<8x32xf32> to vector<8xf32>
    %5 = vector.shape_cast %4 : vector<8xf32> to vector<8x1xf32>
    %cst_6 = arith.constant 3.200000e+01 : f32
    %6 = vector.broadcast %cst_6 : f32 to vector<8x1xf32>
    %7 = arith.divf %5, %6 : vector<8x1xf32>
    %8 = vector.broadcast %7 : vector<8x1xf32> to vector<8x32xf32>
    %9 = arith.subf %1, %8 : vector<8x32xf32>
    %10 = arith.mulf %9, %9 : vector<8x32xf32>
    %cst_7 = arith.constant dense<0.000000e+00> : vector<8xf32>
    %11 = vector.multi_reduction <add>, %10, %cst_7 [1] : vector<8x32xf32> to vector<8xf32>
    %12 = vector.shape_cast %11 : vector<8xf32> to vector<8x1xf32>
    %cst_8 = arith.constant 3.100000e+01 : f32
    %13 = vector.broadcast %cst_8 : f32 to vector<8x1xf32>
    %14 = arith.divf %12, %13 : vector<8x1xf32>
    %15 = math.rsqrt %14 : vector<8x1xf32>
    %16 = vector.broadcast %15 : vector<8x1xf32> to vector<8x32xf32>
    %17 = arith.mulf %9, %16 : vector<8x32xf32>
    %18 = vector.broadcast %2 : vector<1x32xf32> to vector<8x32xf32>
    %19 = arith.mulf %18, %17 : vector<8x32xf32>
    %20 = vector.broadcast %3 : vector<1x32xf32> to vector<8x32xf32>
    %21 = arith.addf %19, %20 : vector<8x32xf32>
    %c0_9 = arith.constant 0 : index
    %c0_10 = arith.constant 0 : index
    %22 = vector.load %arg4[%c0_9, %c0_10] : memref<32x96xf32, #tpu.memory_space<vmem>>, vector<32x96xf32>
    %cst_11 = arith.constant dense<0.000000e+00> : vector<8x96xf32>
    %23 = tpu.matmul %21, %22, %cst_11 {dimension_numbers = #tpu.dot_dimension_numbers<[1], [0], [0], [1], [0, 0, 1, 1], [], []>} : vector<8x32xf32>, vector<32x96xf32>, vector<8x96xf32> -> vector<8x96xf32>
    %c0_12 = arith.constant 0 : index
    %c0_13 = arith.constant 0 : index
    %24 = vector.load %arg5[%c0_12, %c0_13] : memref<1x96xf32, #tpu.memory_space<vmem>>, vector<1x96xf32>
    %25 = vector.broadcast %24 : vector<1x96xf32> to vector<8x96xf32>
    %26 = arith.addf %23, %25 : vector<8x96xf32>
    %27 = vector.extract_strided_slice %26 {offsets = [0, 0], sizes = [8, 32], strides = [1, 1]} : vector<8x96xf32> to vector<8x32xf32>
    %28 = vector.extract_strided_slice %27 {offsets = [0, 0], sizes = [8, 8], strides = [1, 1]} : vector<8x32xf32> to vector<8x8xf32>
    %29 = vector.extract_strided_slice %27 {offsets = [0, 8], sizes = [8, 8], strides = [1, 1]} : vector<8x32xf32> to vector<8x8xf32>
    %30 = vector.extract_strided_slice %27 {offsets = [0, 16], sizes = [8, 8], strides = [1, 1]} : vector<8x32xf32> to vector<8x8xf32>
    %31 = vector.extract_strided_slice %27 {offsets = [0, 24], sizes = [8, 8], strides = [1, 1]} : vector<8x32xf32> to vector<8x8xf32>
    %32 = vector.shape_cast %28 : vector<8x8xf32> to vector<1x8x8xf32>
    %33 = vector.shape_cast %29 : vector<8x8xf32> to vector<1x8x8xf32>
    %34 = vector.shape_cast %30 : vector<8x8xf32> to vector<1x8x8xf32>
    %35 = vector.shape_cast %31 : vector<8x8xf32> to vector<1x8x8xf32>
    %36 = tpu.concatenate %32, %33, %34, %35 in 0 : vector<1x8x8xf32>, vector<1x8x8xf32>, vector<1x8x8xf32>, vector<1x8x8xf32> -> vector<4x8x8xf32>
    %37 = vector.extract_strided_slice %26 {offsets = [0, 32], sizes = [8, 32], strides = [1, 1]} : vector<8x96xf32> to vector<8x32xf32>
    %38 = vector.extract_strided_slice %37 {offsets = [0, 0], sizes = [8, 8], strides = [1, 1]} : vector<8x32xf32> to vector<8x8xf32>
    %39 = vector.extract_strided_slice %37 {offsets = [0, 8], sizes = [8, 8], strides = [1, 1]} : vector<8x32xf32> to vector<8x8xf32>
    %40 = vector.extract_strided_slice %37 {offsets = [0, 16], sizes = [8, 8], strides = [1, 1]} : vector<8x32xf32> to vector<8x8xf32>
    %41 = vector.extract_strided_slice %37 {offsets = [0, 24], sizes = [8, 8], strides = [1, 1]} : vector<8x32xf32> to vector<8x8xf32>
    %42 = vector.shape_cast %38 : vector<8x8xf32> to vector<1x8x8xf32>
    %43 = vector.shape_cast %39 : vector<8x8xf32> to vector<1x8x8xf32>
    %44 = vector.shape_cast %40 : vector<8x8xf32> to vector<1x8x8xf32>
    %45 = vector.shape_cast %41 : vector<8x8xf32> to vector<1x8x8xf32>
    %46 = tpu.concatenate %42, %43, %44, %45 in 0 : vector<1x8x8xf32>, vector<1x8x8xf32>, vector<1x8x8xf32>, vector<1x8x8xf32> -> vector<4x8x8xf32>
    %47 = vector.extract_strided_slice %26 {offsets = [0, 64], sizes = [8, 32], strides = [1, 1]} : vector<8x96xf32> to vector<8x32xf32>
    %48 = vector.extract_strided_slice %47 {offsets = [0, 0], sizes = [8, 8], strides = [1, 1]} : vector<8x32xf32> to vector<8x8xf32>
    %49 = vector.extract_strided_slice %47 {offsets = [0, 8], sizes = [8, 8], strides = [1, 1]} : vector<8x32xf32> to vector<8x8xf32>
    %50 = vector.extract_strided_slice %47 {offsets = [0, 16], sizes = [8, 8], strides = [1, 1]} : vector<8x32xf32> to vector<8x8xf32>
    %51 = vector.extract_strided_slice %47 {offsets = [0, 24], sizes = [8, 8], strides = [1, 1]} : vector<8x32xf32> to vector<8x8xf32>
    %52 = vector.shape_cast %48 : vector<8x8xf32> to vector<1x8x8xf32>
    %53 = vector.shape_cast %49 : vector<8x8xf32> to vector<1x8x8xf32>
    %54 = vector.shape_cast %50 : vector<8x8xf32> to vector<1x8x8xf32>
    %55 = vector.shape_cast %51 : vector<8x8xf32> to vector<1x8x8xf32>
    %56 = tpu.concatenate %52, %53, %54, %55 in 0 : vector<1x8x8xf32>, vector<1x8x8xf32>, vector<1x8x8xf32>, vector<1x8x8xf32> -> vector<4x8x8xf32>
    "tpu.trace_start"() <{level = 10 : i32, message = "hqe,hke->hqk"}> : () -> ()
    %cst_14 = arith.constant dense<0.000000e+00> : vector<4x8x8xf32>
    %57 = tpu.matmul %36, %46, %cst_14 {dimension_numbers = #tpu.dot_dimension_numbers<[2], [2], [1], [1], [0, 0, 0, 1, 1, 1], [0], [0]>} : vector<4x8x8xf32>, vector<4x8x8xf32>, vector<4x8x8xf32> -> vector<4x8x8xf32>
    "tpu.trace_stop"() : () -> ()
    %cst_15 = arith.constant 0.353553385 : f32
    %58 = vector.broadcast %cst_15 : f32 to vector<4x8x8xf32>
    %59 = arith.mulf %57, %58 : vector<4x8x8xf32>
    %60 = tpu.iota {dimensions = array<i32: 0>} : vector<8x8xi32>
    %61 = tpu.iota {dimensions = array<i32: 1>} : vector<8x8xi32>
    %62 = arith.cmpi sgt, %61, %60 : vector<8x8xi32>
    %63 = vector.shape_cast %62 : vector<8x8xi1> to vector<1x8x8xi1>
    %cst_16 = arith.constant -1.000000e+05 : f32
    %64 = vector.shape_cast %63 : vector<1x8x8xi1> to vector<1x8x8xi1>
    %65 = vector.broadcast %64 : vector<1x8x8xi1> to vector<4x8x8xi1>
    %66 = vector.broadcast %cst_16 : f32 to vector<4x8x8xf32>
    %67 = arith.select %65, %66, %59 : vector<4x8x8xi1>, vector<4x8x8xf32>
    %cst_17 = arith.constant dense<0xFF800000> : vector<4x8xf32>
    %68 = vector.multi_reduction <maximumf>, %67, %cst_17 [2] : vector<4x8x8xf32> to vector<4x8xf32>
    %69 = vector.shape_cast %68 : vector<4x8xf32> to vector<4x8x1xf32>
    %70 = vector.broadcast %69 : vector<4x8x1xf32> to vector<4x8x8xf32>
    %71 = arith.subf %67, %70 : vector<4x8x8xf32>
    %72 = math.exp %71 : vector<4x8x8xf32>
    %cst_18 = arith.constant dense<0.000000e+00> : vector<4x8xf32>
    %73 = vector.multi_reduction <add>, %72, %cst_18 [2] : vector<4x8x8xf32> to vector<4x8xf32>
    %74 = vector.shape_cast %73 : vector<4x8xf32> to vector<4x8x1xf32>
    %75 = tpu.reciprocal %74 {approx = true} : vector<4x8x1xf32> -> vector<4x8x1xf32>
    %76 = vector.broadcast %75 : vector<4x8x1xf32> to vector<4x8x8xf32>
    %77 = arith.mulf %72, %76 : vector<4x8x8xf32>
    "tpu.trace_start"() <{level = 10 : i32, message = "hqk,hke->hqe"}> : () -> ()
    %cst_19 = arith.constant dense<0.000000e+00> : vector<4x8x8xf32>
    %78 = tpu.matmul %77, %56, %cst_19 {dimension_numbers = #tpu.dot_dimension_numbers<[2], [1], [1], [2], [0, 0, 0, 1, 1, 2], [0], [0]>} : vector<4x8x8xf32>, vector<4x8x8xf32>, vector<4x8x8xf32> -> vector<4x8x8xf32>
    "tpu.trace_stop"() : () -> ()
    %79 = vector.extract_strided_slice %78 {offsets = [0, 0, 0], sizes = [1, 8, 8], strides = [1, 1, 1]} : vector<4x8x8xf32> to vector<1x8x8xf32>
    %80 = vector.shape_cast %79 : vector<1x8x8xf32> to vector<8x8xf32>
    %81 = vector.extract_strided_slice %78 {offsets = [1, 0, 0], sizes = [1, 8, 8], strides = [1, 1, 1]} : vector<4x8x8xf32> to vector<1x8x8xf32>
    %82 = vector.shape_cast %81 : vector<1x8x8xf32> to vector<8x8xf32>
    %83 = vector.extract_strided_slice %78 {offsets = [2, 0, 0], sizes = [1, 8, 8], strides = [1, 1, 1]} : vector<4x8x8xf32> to vector<1x8x8xf32>
    %84 = vector.shape_cast %83 : vector<1x8x8xf32> to vector<8x8xf32>
    %85 = vector.extract_strided_slice %78 {offsets = [3, 0, 0], sizes = [1, 8, 8], strides = [1, 1, 1]} : vector<4x8x8xf32> to vector<1x8x8xf32>
    %86 = vector.shape_cast %85 : vector<1x8x8xf32> to vector<8x8xf32>
    %87 = tpu.concatenate %80, %82, %84, %86 in 1 : vector<8x8xf32>, vector<8x8xf32>, vector<8x8xf32>, vector<8x8xf32> -> vector<8x32xf32>
    %c0_20 = arith.constant 0 : index
    %c0_21 = arith.constant 0 : index
    %88 = vector.load %arg6[%c0_20, %c0_21] : memref<32x32xf32, #tpu.memory_space<vmem>>, vector<32x32xf32>
    %cst_22 = arith.constant dense<0.000000e+00> : vector<8x32xf32>
    %89 = tpu.matmul %87, %88, %cst_22 {dimension_numbers = #tpu.dot_dimension_numbers<[1], [0], [0], [1], [0, 0, 1, 1], [], []>} : vector<8x32xf32>, vector<32x32xf32>, vector<8x32xf32> -> vector<8x32xf32>
    %c0_23 = arith.constant 0 : index
    %c0_24 = arith.constant 0 : index
    %90 = vector.load %arg7[%c0_23, %c0_24] : memref<1x32xf32, #tpu.memory_space<vmem>>, vector<1x32xf32>
    %91 = vector.broadcast %90 : vector<1x32xf32> to vector<8x32xf32>
    %92 = arith.addf %89, %91 : vector<8x32xf32>
    %93 = arith.addf %1, %92 : vector<8x32xf32>
    %c0_25 = arith.constant 0 : index
    %c0_26 = arith.constant 0 : index
    %94 = vector.load %arg8[%c0_25, %c0_26] : memref<1x32xf32, #tpu.memory_space<vmem>>, vector<1x32xf32>
    %c0_27 = arith.constant 0 : index
    %c0_28 = arith.constant 0 : index
    %95 = vector.load %arg9[%c0_27, %c0_28] : memref<1x32xf32, #tpu.memory_space<vmem>>, vector<1x32xf32>
    %cst_29 = arith.constant dense<0.000000e+00> : vector<8xf32>
    %96 = vector.multi_reduction <add>, %93, %cst_29 [1] : vector<8x32xf32> to vector<8xf32>
    %97 = vector.shape_cast %96 : vector<8xf32> to vector<8x1xf32>
    %cst_30 = arith.constant 3.200000e+01 : f32
    %98 = vector.broadcast %cst_30 : f32 to vector<8x1xf32>
    %99 = arith.divf %97, %98 : vector<8x1xf32>
    %100 = vector.broadcast %99 : vector<8x1xf32> to vector<8x32xf32>
    %101 = arith.subf %93, %100 : vector<8x32xf32>
    %102 = arith.mulf %101, %101 : vector<8x32xf32>
    %cst_31 = arith.constant dense<0.000000e+00> : vector<8xf32>
    %103 = vector.multi_reduction <add>, %102, %cst_31 [1] : vector<8x32xf32> to vector<8xf32>
    %104 = vector.shape_cast %103 : vector<8xf32> to vector<8x1xf32>
    %cst_32 = arith.constant 3.100000e+01 : f32
    %105 = vector.broadcast %cst_32 : f32 to vector<8x1xf32>
    %106 = arith.divf %104, %105 : vector<8x1xf32>
    %107 = math.rsqrt %106 : vector<8x1xf32>
    %108 = vector.broadcast %107 : vector<8x1xf32> to vector<8x32xf32>
    %109 = arith.mulf %101, %108 : vector<8x32xf32>
    %110 = vector.broadcast %94 : vector<1x32xf32> to vector<8x32xf32>
    %111 = arith.mulf %110, %109 : vector<8x32xf32>
    %112 = vector.broadcast %95 : vector<1x32xf32> to vector<8x32xf32>
    %113 = arith.addf %111, %112 : vector<8x32xf32>
    %c0_33 = arith.constant 0 : index
    %c0_34 = arith.constant 0 : index
    %114 = vector.load %arg10[%c0_33, %c0_34] : memref<32x64xf32, #tpu.memory_space<vmem>>, vector<32x64xf32>
    %cst_35 = arith.constant dense<0.000000e+00> : vector<8x64xf32>
    %115 = tpu.matmul %113, %114, %cst_35 {dimension_numbers = #tpu.dot_dimension_numbers<[1], [0], [0], [1], [0, 0, 1, 1], [], []>} : vector<8x32xf32>, vector<32x64xf32>, vector<8x64xf32> -> vector<8x64xf32>
    %c0_36 = arith.constant 0 : index
    %c0_37 = arith.constant 0 : index
    %116 = vector.load %arg11[%c0_36, %c0_37] : memref<1x64xf32, #tpu.memory_space<vmem>>, vector<1x64xf32>
    %117 = vector.broadcast %116 : vector<1x64xf32> to vector<8x64xf32>
    %118 = arith.addf %115, %117 : vector<8x64xf32>
    %cst_38 = arith.constant 5.000000e-01 : f32
    %119 = vector.broadcast %cst_38 : f32 to vector<8x64xf32>
    %120 = arith.mulf %119, %118 : vector<8x64xf32>
    %cst_39 = arith.constant 4.471500e-02 : f32
    %121 = vector.broadcast %cst_39 : f32 to vector<8x64xf32>
    %122 = arith.mulf %121, %118 : vector<8x64xf32>
    %123 = arith.mulf %122, %118 : vector<8x64xf32>
    %124 = arith.mulf %123, %118 : vector<8x64xf32>
    %125 = arith.addf %118, %124 : vector<8x64xf32>
    %cst_40 = arith.constant 0.797884583 : f32
    %126 = vector.broadcast %cst_40 : f32 to vector<8x64xf32>
    %127 = arith.mulf %126, %125 : vector<8x64xf32>
    %128 = math.tanh %127 : vector<8x64xf32>
    %cst_41 = arith.constant 1.000000e+00 : f32
    %129 = vector.broadcast %cst_41 : f32 to vector<8x64xf32>
    %130 = arith.addf %129, %128 : vector<8x64xf32>
    %131 = arith.mulf %120, %130 : vector<8x64xf32>
    %c0_42 = arith.constant 0 : index
    %c0_43 = arith.constant 0 : index
    %132 = vector.load %arg12[%c0_42, %c0_43] : memref<64x32xf32, #tpu.memory_space<vmem>>, vector<64x32xf32>
    %cst_44 = arith.constant dense<0.000000e+00> : vector<8x32xf32>
    %133 = tpu.matmul %131, %132, %cst_44 {dimension_numbers = #tpu.dot_dimension_numbers<[1], [0], [0], [1], [0, 0, 1, 1], [], []>} : vector<8x64xf32>, vector<64x32xf32>, vector<8x32xf32> -> vector<8x32xf32>
    %c0_45 = arith.constant 0 : index
    %c0_46 = arith.constant 0 : index
    %134 = vector.load %arg13[%c0_45, %c0_46] : memref<1x32xf32, #tpu.memory_space<vmem>>, vector<1x32xf32>
    %135 = vector.broadcast %134 : vector<1x32xf32> to vector<8x32xf32>
    %136 = arith.addf %133, %135 : vector<8x32xf32>
    %137 = arith.addf %1, %93 : vector<8x32xf32>
    %138 = arith.addf %137, %136 : vector<8x32xf32>
    %c0_47 = arith.constant 0 : index
    %c0_48 = arith.constant 0 : index
    %c0_49 = arith.constant 0 : index
    %139 = vector.load %arg14[%c0_47, %c0_48, %c0_49] : memref<1x8x32xf32, #tpu.memory_space<vmem>>, vector<1x8x32xf32>
    %140 = vector.shape_cast %139 : vector<1x8x32xf32> to vector<8x32xf32>
    %141 = vector.shape_cast %138 : vector<8x32xf32> to vector<1x8x32xf32>
    tpu.vector_store %arg14[%c0_47, %c0_48, %c0_49], %141 {strides = array<i32>} : memref<1x8x32xf32, #tpu.memory_space<vmem>>, vector<1x8x32xf32>,
    return
  }
  func.func @transform_0(%arg0: i32) -> (i32, i32, i32) {
    %c0_i32 = arith.constant 0 : i32
    %c0_i32_0 = arith.constant 0 : i32
    %c0_i32_1 = arith.constant 0 : i32
    return %arg0, %c0_i32, %c0_i32_0 : i32, i32, i32
  }
  func.func @transform_1(%arg0: i32) -> (i32, i32) {
    %c0_i32 = arith.constant 0 : i32
    %c0_i32_0 = arith.constant 0 : i32
    %c0_i32_1 = arith.constant 0 : i32
    return %c0_i32, %c0_i32_0 : i32, i32
  }
  func.func @transform_2(%arg0: i32) -> (i32, i32) {
    %c0_i32 = arith.constant 0 : i32
    %c0_i32_0 = arith.constant 0 : i32
    %c0_i32_1 = arith.constant 0 : i32
    return %c0_i32, %c0_i32_0 : i32, i32
  }
  func.func @transform_3(%arg0: i32) -> (i32, i32) {
    %c0_i32 = arith.constant 0 : i32
    %c0_i32_0 = arith.constant 0 : i32
    %c0_i32_1 = arith.constant 0 : i32
    return %c0_i32, %c0_i32_0 : i32, i32
  }
  func.func @transform_4(%arg0: i32) -> (i32, i32) {
    %c0_i32 = arith.constant 0 : i32
    %c0_i32_0 = arith.constant 0 : i32
    %c0_i32_1 = arith.constant 0 : i32
    return %c0_i32, %c0_i32_0 : i32, i32
  }
  func.func @transform_5(%arg0: i32) -> (i32, i32) {
    %c0_i32 = arith.constant 0 : i32
    %c0_i32_0 = arith.constant 0 : i32
    %c0_i32_1 = arith.constant 0 : i32
    return %c0_i32, %c0_i32_0 : i32, i32
  }
  func.func @transform_6(%arg0: i32) -> (i32, i32) {
    %c0_i32 = arith.constant 0 : i32
    %c0_i32_0 = arith.constant 0 : i32
    %c0_i32_1 = arith.constant 0 : i32
    return %c0_i32, %c0_i32_0 : i32, i32
  }
  func.func @transform_7(%arg0: i32) -> (i32, i32) {
    %c0_i32 = arith.constant 0 : i32
    %c0_i32_0 = arith.constant 0 : i32
    %c0_i32_1 = arith.constant 0 : i32
    return %c0_i32, %c0_i32_0 : i32, i32
  }
  func.func @transform_8(%arg0: i32) -> (i32, i32) {
    %c0_i32 = arith.constant 0 : i32
    %c0_i32_0 = arith.constant 0 : i32
    %c0_i32_1 = arith.constant 0 : i32
    return %c0_i32, %c0_i32_0 : i32, i32
  }
  func.func @transform_9(%arg0: i32) -> (i32, i32) {
    %c0_i32 = arith.constant 0 : i32
    %c0_i32_0 = arith.constant 0 : i32
    %c0_i32_1 = arith.constant 0 : i32
    return %c0_i32, %c0_i32_0 : i32, i32
  }
  func.func @transform_10(%arg0: i32) -> (i32, i32) {
    %c0_i32 = arith.constant 0 : i32
    %c0_i32_0 = arith.constant 0 : i32
    %c0_i32_1 = arith.constant 0 : i32
    return %c0_i32, %c0_i32_0 : i32, i32
  }
  func.func @transform_11(%arg0: i32) -> (i32, i32) {
    %c0_i32 = arith.constant 0 : i32
    %c0_i32_0 = arith.constant 0 : i32
    %c0_i32_1 = arith.constant 0 : i32
    return %c0_i32, %c0_i32_0 : i32, i32
  }
  func.func @transform_12(%arg0: i32) -> (i32, i32) {
    %c0_i32 = arith.constant 0 : i32
    %c0_i32_0 = arith.constant 0 : i32
    %c0_i32_1 = arith.constant 0 : i32
    return %c0_i32, %c0_i32_0 : i32, i32
  }
  func.func @transform_13(%arg0: i32) -> (i32, i32, i32) {
    %c0_i32 = arith.constant 0 : i32
    %c0_i32_0 = arith.constant 0 : i32
    %c0_i32_1 = arith.constant 0 : i32
    return %arg0, %c0_i32, %c0_i32_0 : i32, i32, i32
  }
}

</mosaic_0001>

<bundles_post_ra>
// kernel: tpu_custom_call.1
= control target key start
LH: loop header
LB: loop body
LE: loop exit
PB: predicated region body
PF: predicated region fallthrough
CT: control target
= control target key end

     0   :  { %s1721_s0 = inlined_call_operand.hbm [shape: f32[2,8,32], index: 0, kind: input, shape index: {}]   ;;  %s1722_s1 = inlined_call_operand.hbm [shape: f32[1,32], index: 1, kind: input, shape index: {}]   ;;  %s1723_s2 = inlined_call_operand.vmem [shape: f32[1,32], index: 2, kind: input, shape index: {}]   ;;  %s1724_s3 = inlined_call_operand.vmem [shape: f32[32,96], index: 3, kind: input, shape index: {}]   ;;  %s1725_s4 = inlined_call_operand.vmem [shape: f32[1,96], index: 4, kind: input, shape index: {}]   ;;  %s1726_s5 = inlined_call_operand.vmem [shape: f32[32,32], index: 5, kind: input, shape index: {}]   ;;  %s1727_s6 = inlined_call_operand.vmem [shape: f32[1,32], index: 6, kind: input, shape index: {}]   ;;  %s1728_s7 = inlined_call_operand.vmem [shape: f32[1,32], index: 7, kind: input, shape index: {}]   ;;  %s1729_s8 = inlined_call_operand.vmem [shape: f32[1,32], index: 8, kind: input, shape index: {}]   ;;  %s1730_s9 = inlined_call_operand.vmem [shape: f32[32,64], index: 9, kind: input, shape index: {}]   ;;  %s1731_s10 = inlined_call_operand.vmem [shape: f32[1,64], index: 10, kind: input, shape index: {}]   ;;  %s1732_s11 = inlined_call_operand.vmem [shape: f32[64,32], index: 11, kind: input, shape index: {}]   ;;  %s1733_s12 = inlined_call_operand.vmem [shape: f32[1,32], index: 12, kind: input, shape index: {}]   ;;  %s1734_s13 = inlined_call_operand.hbm [shape: f32[2,8,32], index: 13, kind: output, shape index: {}]  }
   0x1   :  { %1742 = sst [smem:[#allocation17_spill]] %s1722_s1 }
   0x2   :  { %18 = vsyncpa [#allocation3], 0 }
   0x3   :  { %20 = vsyncpa [#allocation3 + $0x1], 0 }
   0x4   :  { %21 = vsyncpa [#allocation6], 0 }
   0x5   :  { %22 = vsyncpa [#allocation4], 0 }
   0x6   :  { %24 = vsyncpa [#allocation4 + $0x1], 0  ;;  %s1430_s25 = smov 0   ;;  %s1432_s26 = smov 0  }
   0x7   :  { %s1434_s27 = smov 0   ;;  %s1436_s28 = smov 0  }
   0x8 LB: > { %1743 = sst [smem:[#allocation11_spill]] %s1335_s25  ;;  %s1451_s29 = sadd.s32 4294967295, %s1347_s28   ;;  %s1347_s28 = sphi %s1436_s28, %s1759_s28   ;;  %s1343_s27 = sphi %s1434_s27, %s1761_s27   ;;  %s1339_s26 = sphi %s1432_s26, %s1763_s26   ;;  %s1335_s25 = sphi %s1430_s25, %s1762_s25  }
   0x9   : > { %1744 = sst [smem:[#allocation12_spill]] %s1343_s27  ;;  %s1081_s30 = sadd.s32 4294967294, %s1347_s28  }
   0xa   : > { %p50_p0 = scmp.ne.s32.totalorder %s1339_s26, %s1335_s25  ;;  %p51_p1 = scmp.eq.s32.totalorder %s1451_s29, 0 }
   0xb   : > { %p326_p2 = scmp.eq.s32.totalorder %s1451_s29, 1  ;;  %p332_p3 = scmp.eq.s32.totalorder %s1081_s30, 1 }
   0xc   : > { %p1460_p4 = por %p51_p1, %p50_p0  ;;  %p1082_p5 = scmp.ge.s32.totalorder %s1347_s28, 1 }
   0xd   : > { %p1465_p6 = por %p332_p3, %p50_p0  ;;  %p339_p7 = scmp.lt.s32.totalorder %s1347_s28, 3 }
   0xe   : > { %s1748_s1 = sld [smem:[#allocation17_spill]]  ;;  %s1349_s20 = smov [#allocation5]  }
   0xf   : > { %s1746_s15 = scalar_select %p1465_p6, 1, 0 }
  0x10   : > { %p1473_p8 = pnand %p1082_p5, %p339_p7  ;;  %s353_s21 = sshll.u32 %s1349_s20, 4  ;;  %s354_s21 = int_to_ptr.vmem [resolvable:$true] %s353_s21 }
  0x11   : > { %1747 = sst [smem:[#allocation13_spill]] %s1746_s15  ;;  %s1483_s22 = sadd.s32 1, %s1347_s28  }
  0x12   : > { %p1119_p10 = pneg %p1473_p8  ;;  %1750 = sst [smem:[#allocation14_spill]] %s1483_s22 }
  0x13   : > { %s37_s23 = sadd.s32 1, %s1343_s27  ;;  %s34_s24 = ssub.s32 %s1347_s28, %s1483_s22 }
  0x14   : > { %s351_s18 = sshll.u32 %s1748_s1, 4  ;;  %p1120_p11 = pnand %p1119_p10, %p51_p1  ;;  %s352_s18 = int_to_ptr.hbm [resolvable:$true] %s351_s18 }
  0x15   : > { %p35_p12 = scmp.eq.s32.totalorder %s34_s24, 0  ;;  %p44_p13 = scmp.ne.s32.totalorder %s1343_s27, %s1339_s26 }
  0x16   : > { %1122 = dma.hbm_to_vmem [thread:$0]  (!%p1120_p11), %s352_s18, 16, %s354_s21, [#allocation6]  }
  0x17   : > { %p45_p0 = scmp.eq.s32.totalorder %s1347_s28, 0  ;;  %p1496_p3 = por %p326_p2, %p44_p13 }
  0x18   : > { %s1492_s30 = scalar_select %p35_p12, %s1343_s27, %s37_s23  }
  0x19   : > { %s1752_s16 = scalar_select %p1496_p3, 1, 0 }
  0x1a   : > { %1751 = sst [smem:[#allocation15_spill]] %s1492_s30  ;;  %p1132_p5 = scmp.lt.s32.totalorder %s1347_s28, 2 }
  0x1b   : > { %1753 = sst [smem:[#allocation16_spill]] %s1752_s16  ;;  %s397_s17 = sand.u32 1, %s1343_s27  }
  0x1c   : > { %s1086_s20 = sshll.u32 %s1347_s28, 3  ;;  %p46_p7 = por %p45_p0, %p44_p13 }
  0x1d   : > { %s1085_s1 = sshll.u32 %s397_s17, 3  ;;  %s405_s22 = scalar_lea.hbm %s1721_s0, %s1086_s20 }
  0x1e   : > { %s407_s18 = sshll.u32 %s405_s22, 4  ;;  %s401_s21 = scalar_lea.vmem [#allocation2], %s1085_s1  ;;  %s408_s18 = int_to_ptr.hbm [resolvable:$true] %s407_s18 }
  0x1f   : > { %s409_s24 = sshll.u32 %s401_s21, 4  ;;  %p1506_p10 = pnand %p1132_p5, %p46_p7  ;;  %s410_s24 = int_to_ptr.vmem [resolvable:$true] %s409_s24 }
  0x20   : > { %s398_s30 = scalar_lea.sflag [#allocation3], %s397_s17  ;;  %s1247_s16 = sshra.s32 %s408_s18, 4  ;;  %s1248_s16 = int_to_ptr.hbm [resolvable:$true] %s1247_s16 }
  0x21   : > { %s1249_s27 = scalar_lea.hbm %s1248_s16, 8  ;;  %p1251_p11 = pneg %p1506_p10 }
  0x22   : > { %p1250_p2 = scmp.ne.s32.totalorder %s1248_s16, %s1249_s27  ;;  %s1254_s1 = scalar_lea.hbm %s1721_s0, 16 }
  0x23   : > { %p1255_p0 = scmp.lt.s32.totalorder %s1248_s16, %s1721_s0  ;;  %p1256_p5 = scmp.lt.s32.totalorder %s1254_s1, %s1249_s27 }
  0x24   : > { %p1252_p12 = pnand %p1251_p11, %p1250_p2 }
  0x25   : > { %p1257_p7 = por %p1256_p5, %p1255_p0 }
  0x26   : > { %p1253_p13 = pneg %p1252_p12 }
  0x28   : > { %p1258_p9 = pnand %p1257_p7, %p1253_p13 }
  0x2a   : > { %1261 = shalt.err (!%p1258_p9)
}
  0x2b   : > { %1126 = dma.hbm_to_vmem [thread:$0]  (!%p1506_p10), %s408_s18, 128, %s410_s24, %s398_s30  }
  0x2c   : > { %418 = sbr.rel (%p1473_p8) target bundleno = 2017 (0x7e1), region = 72  ;;  %s1523_s17 = sand.u32 (!%p1473_p8), 1, %s1339_s26  }
  0x2d   : > { %s1088_s21 = sshll.u32 (!%p1473_p8), %s1523_s17, 3  ;;  %s421_s25 = scalar_lea.sflag (!%p1473_p8), [#allocation3], %s1523_s17 }
  0x2e   : > { %s424_s27 = scalar_lea.vmem (!%p1473_p8), [#allocation2], %s1088_s21 }
  0x31   : > { %1322 = dma.done.wait (%p1460_p4), %s421_s25, 128  }
  0x32   : > { %1324 = vsyncadd (%p1460_p4), %s421_s25, 4294967168 }
  0x33   : > { %1326 = dma.done.wait (%p51_p1), [#allocation6], 16  }
  0x34   : > { %1328 = vsyncadd (%p51_p1), [#allocation6], 4294967280  ;;  %vm476_vm0 = vcmask 261120   ;;  %v1537_v0 = vld [vmem:[%s424_s27] sm:$0xff]  ;;  %v1350_v2 = vmov 32.0   ;;  %v1351_v14 = vmov 31.0   ;;  %v667_v50 = vlaneseq }
  0x35   : > { %v477_v1 = vsel %vm476_vm0, %v1537_v0, 0.0  ;;  %1191 = vrcp.f32 %v1350_v2  ;;  %v523_v18 = vld [vmem:[%s1724_s3 + $0x18] sm:$0xff]  ;;  %v522_v19 = vld [vmem:[%s1724_s3 + $0x10] sm:$0xff]  ;;  %v521_v20 = vld [vmem:[%s1724_s3 + $0x8] sm:$0xff]  ;;  %s1352_s27 = smov 104   ;;  %s1353_s14 = smov 120  }
  0x36   : > { %478 = vadd.xlane.f32.xlu0 %v477_v1  ;;  %1193 = vrcp.f32 %v1351_v14  ;;  %543 = vmatpush.msra.mxu0 %v523_v18  ;;  %v520_v22 = vld [vmem:[%s1724_s3] sm:$0xff]  ;;  %v1183_v33 = vld [vmem:[#allocation5] ss:$0 sm:$0xff]  ;;  %s1354_s19 = smov 112   ;;  %s1355_s30 = smov 96   ;;  %vm560_vm6 = vcmask 64512  }
  0x37   : > { %v1184_v36 = vld [vmem:[%s1723_s2] ss:$0 sm:$0xff]  ;;  %v668_v51 = vshrl.u32 %v667_v50, 7  ;;  %v670_v52 = vand.u32 127, %v667_v50  ;;  %s1356_s16 = smov 64   ;;  %s1357_s18 = smov 8  }
  0x38   : > { %544 = vmatpush.msra.mxu0 %v522_v19  ;;  %v1185_v39 = vld [vmem:[%s1725_s4] ss:$0 sm:$0xff]  ;;  %s1358_s24 = smov 16   ;;  %s1359_s23 = smov 24   ;;  %v844_v50 = vld [vmem:[%s1726_s5 + $0x8] sm:$0xff]  ;;  %vm839_vm8 = vcmask 130048  }
  0x39   : > { %vm671_vm7 = vcmp.gt.s32.totalorder %v670_v52, %v668_v51  ;;  %v843_v51 = vld [vmem:[%s1726_s5] sm:$0xff]  ;;  %vm841_vm9 = vcmask 195584   ;;  %vm958_vm13 = vcmask 523264   ;;  %s1108_s1 = sshll.u32 %s1451_s29, 3  ;;  %s986_s29 = scalar_lea.sflag [#allocation4], %s1523_s17 }
  0x3a   : > { %545 = vmatpush.msra.mxu0 %v521_v20 }
  0x3b   : > { %v1192_v3 = vpop.eup %1191 }
  0x3c   : > { %v481_v4 = vmul.f32 32.0, %v1192_v3  ;;  %vm485_vm1 = vweird.f32 %v1192_v3  ;;  %v1194_v15 = vpop.eup %1193  ;;  %546 = vmatpush.msra.mxu0 %v520_v22 }
  0x3d   : > { %v494_v16 = vmul.f32 31.0, %v1194_v15  ;;  %vm498_vm2 = vweird.f32 %v1194_v15 }
  0x3e   : > { %v482_v5 = vsub.f32 1.0, %v481_v4 }
  0x3f   : > { %v495_v17 = vsub.f32 1.0, %v494_v16 }
  0x40   : > { %v483_v6 = vmul.f32 %v1192_v3, %v482_v5 }
  0x41   : > { %v496_v21 = vmul.f32 %v1194_v15, %v495_v17 }
  0x42   : > { %v484_v7 = vadd.f32 %v1192_v3, %v483_v6 }
  0x43   : > { %v497_v23 = vadd.f32 %v1194_v15, %v496_v21 }
  0x44   : > { %v1541_v8 = vsel %vm485_vm1, %v1192_v3, %v484_v7 }
  0x45   : > { %v1558_v24 = vsel %vm498_vm2, %v1194_v15, %v497_v23 }
  0xa9   : > { %v479_v9 = vpop.xlane.xlu0 %478 }
  0xaa   : > { %v487_v10 = vmul.f32 %v1541_v8, %v479_v9 }
  0xac   : > { %v488_v11 = vsub.f32 %v1537_v0, %v487_v10 }
  0xae   : > { %v489_v12 = vmul.f32 %v488_v11, %v488_v11 }
  0xb0   : > { %v490_v13 = vsel %vm476_vm0, %v489_v12, 0.0 }
  0xb1   : > { %491 = vadd.xlane.f32.xlu0 %v490_v13 }
 0x124   : > { %v492_v25 = vpop.xlane.xlu0 %491 }
 0x125   : > { %v500_v26 = vmul.f32 %v1558_v24, %v492_v25 }
 0x127   : > { %1195 = vrsqrt.f32 %v500_v26  ;;  %vm507_vm4 = vweird.f32 %v500_v26 }
 0x12d   : > { %v1196_v27 = vpop.eup %1195 }
 0x12e   : > { %v502_v28 = vmul.f32 %v1196_v27, %v500_v26  ;;  %vm508_vm3 = vweird.f32 %v1196_v27 }
 0x12f   : > { %vm509_vm5 = vmor %vm507_vm4, %vm508_vm3 }
 0x130   : > { %v503_v29 = vmul.f32 %v1196_v27, %v502_v28 }
 0x132   : > { %v504_v30 = vmul.f32 0.5, %v503_v29 }
 0x134   : > { %v505_v31 = vsub.f32 1.5, %v504_v30 }
 0x136   : > { %v506_v32 = vmul.f32 %v1196_v27, %v505_v31 }
 0x138   : > { %v510_v34 = vsel %vm509_vm5, %v1196_v27, %v506_v32 }
 0x139   : > { %v511_v35 = vmul.f32 %v510_v34, %v488_v11 }
 0x13b   : > { %v515_v37 = vmul.f32 %v1183_v33, %v511_v35 }
 0x13d   : > { %v519_v38 = vadd.f32 %v1184_v36, %v515_v37 }
 0x13f   : > { %1091 = vmatmul.msk.f32.vlgmr.msra.gmra.mxu0 %vm476_vm0, %v519_v38 }
 0x1bc   : > { %v548_v40 = vpop.f32.mrf.mxu0 }
 0x1bd   : > { %v1568_v41 = vadd.f32 %v1185_v39, %v548_v40 }
 0x1bf   : > { %556 = vrot.lane.b32.xlu2 %v1568_v41, %s1352_s27  ;;  %552 = vrot.lane.b32.xlu1 %v1568_v41, %s1353_s14  ;;  %s996_s14 = scalar_lea.hbm %s1734_s13, %s1108_s1  ;;  %s1297_s1 = scalar_lea.hbm %s1734_s13, 16 }
 0x1c7   : > { %554 = vrot.lane.b32.xlu1 %v1568_v41, %s1354_s19 }
 0x1cf   : > { %558 = vrot.lane.b32.xlu1 %v1568_v41, %s1355_s30 }
 0x219   : > { %v1574_v43 = vpop.permute.xlu2 %556 }
 0x231   : > { %v553_v42 = vpop.permute.xlu1 %552 }
 0x232   : > { %585 = vrot.lane.b32.xlu2 %v553_v42, %s1355_s30 }
 0x239   : > { %v555_v44 = vpop.permute.xlu1 %554 }
 0x23a   : > { %637 = vrot.lane.b32.xlu2 %v1574_v43, %s1355_s30  ;;  %611 = vrot.lane.b32.xlu0 %v555_v44, %s1355_s30  ;;  %v1178_v61 = vpack.i.bf16 %v555_v44, %v553_v42  ;;  %s472_s30 = scalar_lea.vmem [#allocation7], %s1088_s21 }
 0x241   : > { %v559_v45 = vpop.permute.xlu1 %558 }
 0x242   : > { %1092 = vmatpush.xpose.msk.msra.mxu1 %vm560_vm6, %v559_v45 }
 0x245   : > { %1093 = vmatmul.msk.f32.vlgmr.msra.gmra.mxu1 %vm560_vm6, %v1568_v41 }
 0x28c   : > { %v586_v46 = vpop.permute.xlu2 %585 }
 0x28d   : > { %1094 = vmatpush.xpose.msk.msra.mxu2 %vm560_vm6, %v586_v46 }
 0x290   : > { %1095 = vmatmul.msk.f32.vlgmr.msra.gmra.mxu2 %vm560_vm6, %v553_v42 }
 0x294   : > { %v638_v47 = vpop.permute.xlu2 %637 }
 0x295   : > { %1098 = vmatpush.xpose.msk.msrb.mxu1 %vm560_vm6, %v638_v47 }
 0x298   : > { %1099 = vmatmul.msk.f32.vlgmr.msrb.gmra.mxu1 %vm560_vm6, %v1574_v43 }
 0x2ac   : > { %v612_v48 = vpop.permute.xlu0 %611 }
 0x2ad   : > { %1096 = vmatpush.xpose.msk.msra.mxu3 %vm560_vm6, %v612_v48  ;;  %v846_v48 = vld [vmem:[%s1726_s5 + $0x18] sm:$0xff] }
 0x2b0   : > { %1097 = vmatmul.msk.f32.vlgmr.msra.gmra.mxu3 %vm560_vm6, %v555_v44 }
 0x2c2   : > { %v582_v49 = vpop.f32.mrf.mxu1 }
 0x2c3   : > { %v663_v3 = vmul.f32 0.35355338, %v582_v49  ;;  %v845_v49 = vld [vmem:[%s1726_s5 + $0x10] sm:$0xff] }
 0x2c5   : > { %v674_v4 = vsel %vm671_vm7, -100000.0, %v663_v3 }
 0x2c6   : > { %v678_v5 = vsel %vm560_vm6, %v674_v4, -inf }
 0x313   : > { %v608_v53 = vpop.f32.mrf.mxu2 }
 0x314   : > { %v664_v54 = vmul.f32 0.35355338, %v608_v53 }
 0x315   : > { %v660_v55 = vpop.f32.mrf.mxu1 }
 0x316   : > { %v666_v56 = vmul.f32 0.35355338, %v660_v55  ;;  %v675_v57 = vsel %vm671_vm7, -100000.0, %v664_v54 }
 0x317   : > { %v681_v58 = vsel %vm560_vm6, %v675_v57, -inf }
 0x318   : > { %682 = vmax.xlane.f32.xlu1 %v681_v58  ;;  %v677_v59 = vsel %vm671_vm7, -100000.0, %v666_v56 }
 0x319   : > { %v687_v60 = vsel %vm560_vm6, %v677_v59, -inf }
 0x31a   : > { %688 = vmax.xlane.f32.xlu0 %v687_v60 }
 0x32e   : > { %1179 = vrot.lane.b32.xlu0 %v1178_v61, %s1356_s16 }
 0x333   : > { %v634_v62 = vpop.f32.mrf.mxu3 }
 0x334   : > { %v665_v63 = vmul.f32 0.35355338, %v634_v62 }
 0x336   : > { %v676_v1 = vsel %vm671_vm7, -100000.0, %v665_v63 }
 0x337   : > { %v684_v2 = vsel %vm560_vm6, %v676_v1, -inf }
 0x338   : > { %685 = vmax.xlane.f32.xlu2 %v684_v2 }
 0x340   : > { %679 = vmax.xlane.f32.xlu2 %v678_v5 }
 0x38b   : > { %v683_v6 = vpop.xlane.xlu1 %682 }
 0x38c   : > { %v691_v10 = vsub.f32 %v675_v57, %v683_v6  ;;  %v909_v6 = vld [vmem:[%s1730_s9 + $0x18] sm:$0xff] }
 0x38d   : > { %v689_v7 = vpop.xlane.xlu0 %688 }
 0x38e   : > { %v693_v9 = vsub.f32 %v677_v59, %v689_v7  ;;  %v696_v12 = vmul.f32 1.442695, %v691_v10  ;;  %v1186_v59 = vld [vmem:[%s1727_s6] ss:$0 sm:$0xff]  ;;  %v908_v7 = vld [vmem:[%s1730_s9 + $0x10] sm:$0xff] }
 0x390   : > { %v700_v11 = vmul.f32 1.442695, %v693_v9  ;;  %v906_v9 = vld [vmem:[%s1730_s9] sm:$0xff] }
 0x392   : > { %1197 = vpow2.f32 %v700_v11 }
 0x393   : > { %1199 = vpow2.f32 %v696_v12 }
 0x398   : > { %v1198_v13 = vpop.eup %1197 }
 0x399   : > { %v711_v14 = vsel %vm560_vm6, %v1198_v13, 0.0  ;;  %v1200_v15 = vpop.eup %1199 }
 0x39a   : > { %712 = vadd.xlane.f32.xlu1 %v711_v14  ;;  %v705_v18 = vsel %vm560_vm6, %v1200_v15, 0.0 }
 0x3a0   : > { %v1180_v16 = vpop.permute.xlu0 %1179 }
 0x3a1   : > { %v1182_v17 = vunpack.i.h.bf16 %v1180_v16  ;;  %v1181_v19 = vunpack.i.l.bf16 %v1180_v16 }
 0x3a2   : > { %706 = vadd.xlane.f32.xlu1 %v705_v18  ;;  %v1187_v18 = vld [vmem:[%s1728_s7] ss:$0 sm:$0xff] }
 0x3a3   : > { %769 = vmatpush.msrb.mxu3 %v1181_v19  ;;  %795 = vmatpush.msra.mxu1 %v1182_v17 }
 0x3a5   : > { %929 = vmatpush.msra.mxu3 %v909_v6 }
 0x3a7   : > { %930 = vmatpush.msra.mxu3 %v908_v7 }
 0x3ab   : > { %v686_v20 = vpop.xlane.xlu2 %685 }
 0x3ac   : > { %v692_v21 = vsub.f32 %v676_v1, %v686_v20 }
 0x3ae   : > { %v698_v22 = vmul.f32 1.442695, %v692_v21 }
 0x3b0   : > { %1201 = vpow2.f32 %v698_v22 }
 0x3b3   : > { %v680_v23 = vpop.xlane.xlu2 %679 }
 0x3b4   : > { %v690_v25 = vsub.f32 %v674_v4, %v680_v23  ;;  %v953_v23 = vld [vmem:[%s1732_s11 + $0x38] sm:$0xff] }
 0x3b5   : > { %970 = vmatpush.msrb.mxu0 %v953_v23 }
 0x3b6   : > { %v1202_v26 = vpop.eup %1201  ;;  %v694_v27 = vmul.f32 1.442695, %v690_v25  ;;  %v952_v25 = vld [vmem:[%s1732_s11 + $0x30] sm:$0xff] }
 0x3b7   : > { %v708_v28 = vsel %vm560_vm6, %v1202_v26, 0.0  ;;  %971 = vmatpush.msrb.mxu0 %v952_v25 }
 0x3b8   : > { %1203 = vpow2.f32 %v694_v27  ;;  %709 = vadd.xlane.f32.xlu2 %v708_v28  ;;  %v950_v27 = vld [vmem:[%s1732_s11 + $0x20] sm:$0xff]  ;;  %v949_v28 = vld [vmem:[%s1732_s11 + $0x18] sm:$0xff] }
 0x3be   : > { %v1204_v29 = vpop.eup %1203 }
 0x3bf   : > { %v702_v30 = vsel %vm560_vm6, %v1204_v29, 0.0 }
 0x3c0   : > { %703 = vadd.xlane.f32.xlu1 %v702_v30  ;;  %v947_v30 = vld [vmem:[%s1732_s11 + $0x8] sm:$0xff] }
 0x3d0   : > { %800 = vrot.lane.b32.xlu2 %v1574_v43, %s1356_s16 }
 0x3d9   : > { %722 = vrot.lane.b32.xlu1 %v1568_v41, %s1356_s16  ;;  %s998_s16 = sshll.u32 %s472_s30, 4  ;;  %s999_s16 = int_to_ptr.vmem [resolvable:$true] %s998_s16 }
 0x40d   : > { %v713_v31 = vpop.xlane.xlu1 %712 }
 0x415   : > { %v707_v32 = vpop.xlane.xlu1 %706 }
 0x416   : > { %1205 = vrcp.f32 %v707_v32  ;;  %v1189_v32 = vld [vmem:[%s1731_s10] ss:$0 sm:$0xff] }
 0x41c   : > { %v1206_v33 = vpop.eup %1205 }
 0x41d   : > { %v719_v34 = vmul.f32 %v1206_v33, %v1200_v15 }
 0x41f   : > { %1101 = vmatmul.msk.f32.vlgmr.msrb.gmra.mxu3 %vm560_vm6, %v719_v34 }
 0x42b   : > { %v710_v35 = vpop.xlane.xlu2 %709 }
 0x42c   : > { %1207 = vrcp.f32 %v710_v35 }
 0x42d   : > { %1209 = vrcp.f32 %v713_v31  ;;  %v946_v31 = vld [vmem:[%s1732_s11] sm:$0xff] }
 0x432   : > { %v1208_v36 = vpop.eup %1207 }
 0x433   : > { %v720_v37 = vmul.f32 %v1208_v36, %v1202_v26  ;;  %v801_v38 = vpop.permute.xlu2 %800  ;;  %v1210_v39 = vpop.eup %1209  ;;  %v951_v26 = vld [vmem:[%s1732_s11 + $0x28] sm:$0xff] }
 0x434   : > { %821 = vmatpush.msrb.mxu1 %v801_v38  ;;  %v721_v40 = vmul.f32 %v1210_v39, %v1198_v13  ;;  %v704_v41 = vpop.xlane.xlu1 %703  ;;  %972 = vmatpush.msrb.mxu0 %v951_v26 }
 0x435   : > { %1102 = vmatmul.msk.f32.vlgmr.msra.gmra.mxu1 %vm560_vm6, %v720_v37  ;;  %1211 = vrcp.f32 %v704_v41 }
 0x436   : > { %973 = vmatpush.msrb.mxu0 %v950_v27 }
 0x438   : > { %974 = vmatpush.msrb.mxu0 %v949_v28 }
 0x43b   : > { %v1212_v42 = vpop.eup %1211 }
 0x43c   : > { %v718_v44 = vmul.f32 %v1212_v42, %v1204_v29  ;;  %v948_v29 = vld [vmem:[%s1732_s11 + $0x10] sm:$0xff] }
 0x43d   : > { %1103 = vmatmul.msk.f32.vlgmr.msrb.gmra.mxu1 %vm560_vm6, %v721_v40  ;;  %975 = vmatpush.msrb.mxu0 %v948_v29 }
 0x43f   : > { %976 = vmatpush.msrb.mxu0 %v947_v30 }
 0x441   : > { %977 = vmatpush.msrb.mxu0 %v946_v31 }
 0x44b   : > { %v723_v43 = vpop.permute.xlu1 %722 }
 0x44c   : > { %743 = vmatpush.msrb.mxu2 %v723_v43 }
 0x44d   : > { %1100 = vmatmul.msk.f32.vlgmr.msrb.gmra.mxu2 %vm560_vm6, %v718_v44  ;;  %v1190_v44 = vld [vmem:[%s1733_s12] ss:$0 sm:$0xff] }
 0x44e   : > { %866 = vmatpush.msra.mxu2 %v846_v48 }
 0x450   : > { %867 = vmatpush.msra.mxu2 %v845_v49 }
 0x452   : > { %868 = vmatpush.msra.mxu2 %v844_v50 }
 0x454   : > { %869 = vmatpush.msra.mxu2 %v843_v51 }
 0x4a2   : > { %v771_v45 = vpop.f32.mrf.mxu3 }
 0x4a3   : > { %827 = vrot.lane.b32.xlu0 %v771_v45, %s1357_s18  ;;  %s1000_s18 = sshll.u32 %s996_s14, 4  ;;  %s1001_s18 = int_to_ptr.hbm [resolvable:$true] %s1000_s18 }
 0x4b2   : > { %v797_v46 = vpop.f32.mrf.mxu1 }
 0x4b3   : > { %831 = vrot.lane.b32.xlu2 %v797_v46, %s1358_s24  ;;  %s1291_s24 = sshra.s32 %s1001_s18, 4  ;;  %s1292_s24 = int_to_ptr.hbm [resolvable:$true] %s1291_s24 }
 0x4b4   : > { %p1298_p9 = scmp.lt.s32.totalorder %s1292_s24, %s1734_s13 }
 0x4ba   : > { %v823_v47 = vpop.f32.mrf.mxu1 }
 0x4bb   : > { %835 = vrot.lane.b32.xlu0 %v823_v47, %s1359_s23  ;;  %s1293_s23 = scalar_lea.hbm %s1292_s24, 8 }
 0x4bc   : > { %p1294_p1 = scmp.ne.s32.totalorder %s1292_s24, %s1293_s23  ;;  %p1299_p10 = scmp.lt.s32.totalorder %s1297_s1, %s1293_s23 }
 0x4be   : > { %p1295_p4 = pnand %p1294_p1, %p1496_p3  ;;  %p1300_p2 = por %p1299_p10, %p1298_p9 }
 0x4c0   : > { %p1296_p8 = pneg %p1295_p4 }
 0x4c2   : > { %p1301_p11 = pnand %p1300_p2, %p1296_p8 }
 0x4d0   : > { %v745_v53 = vpop.f32.mrf.mxu2 }
 0x50d   : > { %v832_v55 = vpop.permute.xlu2 %831 }
 0x515   : > { %v828_v52 = vpop.permute.xlu0 %827 }
 0x516   : > { %v838_v54 = vsel %vm560_vm6, %v745_v53, %v828_v52 }
 0x517   : > { %v840_v56 = vsel %vm839_vm8, %v838_v54, %v832_v55 }
 0x52d   : > { %v836_v57 = vpop.permute.xlu0 %835 }
 0x52e   : > { %v842_v58 = vsel %vm841_vm9, %v840_v56, %v836_v57 }
 0x52f   : > { %1104 = vmatmul.msk.f32.vlgmr.msra.gmra.mxu2 %vm476_vm0, %v842_v58 }
 0x5b2   : > { %v871_v60 = vpop.f32.mrf.mxu2 }
 0x5b3   : > { %v872_v61 = vadd.f32 %v1186_v59, %v871_v60 }
 0x5b5   : > { %v1626_v62 = vadd.f32 %v872_v61, %v1537_v0 }
 0x5b7   : > { %v877_v63 = vsel %vm476_vm0, %v1626_v62, 0.0  ;;  %v982_v47 = vadd.f32 %v1626_v62, %v1537_v0 }
 0x5b8   : > { %878 = vadd.xlane.f32.xlu2 %v877_v63 }
 0x62b   : > { %v879_v1 = vpop.xlane.xlu2 %878 }
 0x62c   : > { %v880_v2 = vmul.f32 %v879_v1, %v1541_v8  ;;  %v907_v8 = vld [vmem:[%s1730_s9 + $0x8] sm:$0xff] }
 0x62d   : > { %931 = vmatpush.msra.mxu3 %v907_v8 }
 0x62e   : > { %v881_v3 = vsub.f32 %v1626_v62, %v880_v2 }
 0x62f   : > { %932 = vmatpush.msra.mxu3 %v906_v9 }
 0x630   : > { %v882_v4 = vmul.f32 %v881_v3, %v881_v3 }
 0x632   : > { %v883_v5 = vsel %vm476_vm0, %v882_v4, 0.0 }
 0x633   : > { %884 = vadd.xlane.f32.xlu0 %v883_v5 }
 0x6a6   : > { %v885_v10 = vpop.xlane.xlu0 %884 }
 0x6a7   : > { %v886_v11 = vmul.f32 %v885_v10, %v1558_v24  ;;  %v1188_v24 = vld [vmem:[%s1729_s8] ss:$0 sm:$0xff] }
 0x6a9   : > { %1213 = vrsqrt.f32 %v886_v11  ;;  %vm893_vm11 = vweird.f32 %v886_v11 }
 0x6af   : > { %v1214_v12 = vpop.eup %1213 }
 0x6b0   : > { %v888_v13 = vmul.f32 %v1214_v12, %v886_v11  ;;  %vm894_vm10 = vweird.f32 %v1214_v12 }
 0x6b1   : > { %vm895_vm12 = vmor %vm893_vm11, %vm894_vm10 }
 0x6b2   : > { %v889_v14 = vmul.f32 %v1214_v12, %v888_v13 }
 0x6b4   : > { %v890_v15 = vmul.f32 0.5, %v889_v14 }
 0x6b6   : > { %v891_v16 = vsub.f32 1.5, %v890_v15 }
 0x6b8   : > { %v892_v17 = vmul.f32 %v1214_v12, %v891_v16 }
 0x6ba   : > { %v896_v19 = vsel %vm895_vm12, %v1214_v12, %v892_v17 }
 0x6bb   : > { %v897_v20 = vmul.f32 %v896_v19, %v881_v3 }
 0x6bd   : > { %v901_v21 = vmul.f32 %v1187_v18, %v897_v20 }
 0x6bf   : > { %v905_v22 = vadd.f32 %v1188_v24, %v901_v21 }
 0x6c1   : > { %1105 = vmatmul.msk.f32.vlgmr.msra.gmra.mxu3 %vm476_vm0, %v905_v22 }
 0x744   : > { %v934_v33 = vpop.f32.mrf.mxu3 }
 0x745   : > { %v935_v34 = vadd.f32 %v1189_v32, %v934_v33 }
 0x747   : > { %v938_v35 = vmul.f32 0.044715, %v935_v34  ;;  %v937_v41 = vmul.f32 0.5, %v935_v34 }
 0x749   : > { %v939_v36 = vmul.f32 %v938_v35, %v935_v34 }
 0x74b   : > { %v940_v37 = vmul.f32 %v939_v36, %v935_v34 }
 0x74d   : > { %v941_v38 = vadd.f32 %v940_v37, %v935_v34 }
 0x74f   : > { %v942_v39 = vmul.f32 0.7978846, %v941_v38 }
 0x751   : > { %1215 = vtanh.f32 %v942_v39 }
 0x757   : > { %v1216_v40 = vpop.eup %1215 }
 0x758   : > { %v944_v42 = vadd.f32 1.0, %v1216_v40 }
 0x75a   : > { %v945_v43 = vmul.f32 %v944_v42, %v937_v41 }
 0x75c   : > { %1106 = vmatmul.msk.f32.vlgmr.msrb.gmra.mxu0 %vm958_vm13, %v945_v43 }
 0x7d9   : > { %v979_v45 = vpop.f32.mrf.mxu0 }
 0x7da   : > { %v980_v46 = vadd.f32 %v1190_v44, %v979_v45 }
 0x7dc   : > { %v983_v48 = vadd.f32 %v982_v47, %v980_v46 }
 0x7de   : > { %984 = vst.msk [vmem:[%s472_s30] sm:$0xff] %vm476_vm0, %v983_v48 }
 0x7df   : > { %1304 = shalt.err (!%p1301_p11)
}
 0x7e0   : > { %1117 = dma.vmem_to_hbm [thread:$0]  (%p1496_p3), %s999_s16, 128, %s1001_s18, %s986_s29  }
 0x7e1 PF: > { %s1756_s17 = sld [smem:[#allocation11_spill]]  ;;  %p1758_p12 = scmp.ge.s32.totalorder %s1347_s28, 2 }
 0x7e3   : > { %p1128_p13 = pnand %p1758_p12, %p1465_p6 }
 0x7e5   : > { %p1129_p0 = pneg %p1128_p13 }
 0x7e7   : > { %s1012_s27 = sand.u32 1, %s1756_s17  }
 0x7e8   : > { %s1013_s14 = scalar_lea.sflag [#allocation4], %s1012_s27 }
 0x7e9   : > { %1330 = dma.done.wait (%p1129_p0), %s1013_s14, 128  }
 0x7ea   : > { %1332 = vsyncadd (%p1129_p0), %s1013_s14, 4294967168  ;;  %s1759_s28 = sld [smem:[#allocation14_spill]]  ;;  %s1762_s25 = smov %s1339_s26 }
 0x7eb   : > { %s1760_s30 = sld [smem:[#allocation12_spill]] }
 0x7ec   : > { %s1761_s27 = sld [smem:[#allocation15_spill]] }
 0x7f0   : > { %p27_p5 = scmp.ge.s32.totalorder %s1759_s28, 4  }
 0x7f1   : > { %s1763_s26 = smov %s1760_s30 }
 0x7f2   :  { %29 = sbr.rel (!%p27_p5) target bundleno = 8 (0x8), region = 121 }
 0x7f7   :  { %1019 = vsyncpa [#allocation3], 1 }
 0x7f8   :  { %1021 = vsyncpa [#allocation3 + $0x1], 1 }
 0x7f9   :  { %1022 = vsyncpa [#allocation6], 1 }
 0x7fa   :  { %1023 = vsyncpa [#allocation4], 1 }
 0x7fb   :  { %1025 = vsyncpa [#allocation4 + $0x1], 1 }

</bundles_post_ra>
